<compile_context>
chip_gen: v7x
topology: tpu7x:2x2x1
jax: 0.10.0
libtpu: 0.0.40
codegen_flags: <defaults>
</compile_context>

<pallas_src>
import functools

import jax
import jax.numpy as jnp
import numpy as np
from jax.experimental import pallas as pl
from jax.experimental.pallas import tpu as pltpu


def _round_up(x, m):
  return (x + m - 1) // m * m


@functools.lru_cache()
def _max_batch_tile():
  """Per-generation cap on rows per batch tile (review opts 4-6).

  Working set is ~2 KiB of VMEM per tile row (bf16 activation DMA buffers plus
  f32 intermediates h/z); keep it well under physical VMEM:
  ~4096 rows on v5e/v6e (128 MiB VMEM), ~2048 rows on v7x (64 MiB VMEM).
  """
  try:
    vmem_bytes = int(pltpu.get_tpu_info().vmem_capacity_bytes)
  except Exception:  # interpret mode / API drift -> conservative default
    vmem_bytes = 64 << 20
  rows = vmem_bytes // (16 * 2048)
  return int(min(4096, max(256, (rows // 16) * 16)))


# -----------------------------------------------------------------------------
# Pallas kernel: one batch tile of the whole MLP (5 MXU matmuls + VPU epilogue).
# -----------------------------------------------------------------------------
def _content_model_kernel(
    ids_ref,                              # (TB, 2) int32: [business | product]
    feat_ref,                             # (TB, F)  bf16
    wg_b_ref, wg_p_ref,                   # (nB,128), (nP,128) bf16: emb folded thru wp1
    wf1_ref, bf1_ref,                     # feature_processor L1 (BN1 folded)
    wf2_ref, bf2_ref,                     # feature_processor L2 (BN2 folded)
    wp1f_ref, bp1_ref,                    # predictor L1: femb rows of wp1 + folded bias
    wp2_ref, bp2_ref,                     # predictor L2
    wp3_ref, bp3_ref,                     # predictor L3 (row vector + scalar)
    out_ref,                              # (1, 1, TB) f32, lane-dense scores
):
  f32, bf16 = jnp.float32, jnp.bfloat16
  tb = feat_ref.shape[0]

  # ---- fused embedding "gather" (opt 1): one_hot(ids) @ table on the MXU.
  #      Tables are pre-folded through predictor-L1's first 2E rows (opt 9), so
  #      the gathers directly yield the (TB, 128) L1 partial sums — no concat.
  bids = ids_ref[:, 0:1]
  pids = ids_ref[:, 1:2]
  iota_b = jax.lax.broadcasted_iota(jnp.int32, (tb, wg_b_ref.shape[0]), 1)
  iota_p = jax.lax.broadcasted_iota(jnp.int32, (tb, wg_p_ref.shape[0]), 1)
  onehot_b = jnp.where(bids == iota_b, 1.0, 0.0).astype(bf16)
  onehot_p = jnp.where(pids == iota_p, 1.0, 0.0).astype(bf16)
  z = jnp.dot(onehot_b, wg_b_ref[...], preferred_element_type=f32)
  z = z + jnp.dot(onehot_p, wg_p_ref[...], preferred_element_type=f32)

  # ---- feature_processor (BN folded into Linear, Dropout = identity) --------
  h = jnp.dot(feat_ref[...], wf1_ref[...], preferred_element_type=f32)
  h = jnp.maximum(h + bf1_ref[...], 0.0).astype(bf16)
  femb = jnp.dot(h, wf2_ref[...], preferred_element_type=f32)
  femb = jnp.maximum(femb + bf2_ref[...], 0.0).astype(bf16)

  # ---- predictor L1 (femb contribution) + L2 ---------------------------------
  z = z + jnp.dot(femb, wp1f_ref[...], preferred_element_type=f32)
  z = jnp.maximum(z + bp1_ref[...], 0.0).astype(bf16)
  z = jnp.dot(z, wp2_ref[...], preferred_element_type=f32)
  z = jnp.maximum(z + bp2_ref[...], 0.0)

  # ---- predictor L3 (64 -> 1) on VPU + XLU, sigmoid, lane-dense store (opt 8)
  s = jnp.sum(z * wp3_ref[...], axis=-1, keepdims=True) + bp3_ref[...]   # (TB, 1)
  out_ref[...] = jax.nn.sigmoid(jnp.transpose(s))[None, :, :]            # (1, 1, TB)


# -----------------------------------------------------------------------------
# Wrapper: id packing, batch tiling / padding, pallas_call with batch grid.
# -----------------------------------------------------------------------------
@jax.jit
def regularized_content_model_forward(business_ids, product_ids, features,
                                      fparams):
  B, F = features.shape

  # Pack ids into one (B, 2) int32 block; cast features to bf16 so the
  # batch-tile DMA moves half the bytes (opt 2).
  ids = jnp.stack([business_ids.astype(jnp.int32),
                   product_ids.astype(jnp.int32)], axis=1)
  feats = features.astype(jnp.bfloat16)

  # ---- batch tiling (opts 3-6): even number of grid steps for v7x's 2 TCs, --
  # ---- tile rows rounded to 16 (bf16 sublane packing), per-gen max tile. -----
  max_tb = _max_batch_tile()
  if B <= 32:
    n_tiles, tb = 1, _round_up(B, 16)
  else:
    n_tiles = max(2, pl.cdiv(B, max_tb))
    n_tiles += n_tiles % 2
    tb = _round_up(pl.cdiv(B, n_tiles), 16)
  B_pad = n_tiles * tb

  # Only the small per-row inputs are padded now (opt 7); the old (B,128)
  # bpemb pad/round-trip is gone.  Padded id 0 is a valid row; padded rows are
  # sliced off below.
  if B_pad != B:
    ids = jnp.pad(ids, ((0, B_pad - B), (0, 0)))
    feats = jnp.pad(feats, ((0, B_pad - B), (0, 0)))

  weights = (
      fparams["wg_b"], fparams["wg_p"],
      fparams["wf1"], fparams["bf1"],
      fparams["wf2"], fparams["bf2"],
      fparams["wp1f"], fparams["bp1"],
      fparams["wp2"], fparams["bp2"],
      fparams["wp3"], fparams["bp3"],
  )

  scores = pl.pallas_call(
      _content_model_kernel,
      out_shape=jax.ShapeDtypeStruct((n_tiles, 1, tb), jnp.float32),
      grid=(n_tiles,),
      in_specs=[pl.BlockSpec((tb, 2), lambda i: (i, 0)),
                pl.BlockSpec((tb, F), lambda i: (i, 0))]
               + [pl.BlockSpec(w.shape, lambda i: (0, 0)) for w in weights],
      out_specs=pl.BlockSpec((1, 1, tb), lambda i: (i, 0, 0)),
      compiler_params=pltpu.CompilerParams(
          dimension_semantics=("parallel",),
          vmem_limit_bytes=32 * 1024 * 1024),   # above v5e's 16 MiB default
  )(ids, feats, *weights)

  return scores.reshape(B_pad)[:B]              # torch .squeeze() -> [B]


# -----------------------------------------------------------------------------
# Parameter construction (raw PyTorch-equivalent) + folding for the kernel.
# -----------------------------------------------------------------------------
def make_params(key, n_businesses, n_products, n_features, embedding_dim):
  keys = jax.random.split(key, 10)
  f32 = jnp.float32

  def lin(k, fan_in, fan_out):
    bound = 1.0 / np.sqrt(fan_in)
    kw, kb = jax.random.split(k)
    w = jax.random.uniform(kw, (fan_in, fan_out), f32, -bound, bound)  # [in,out]
    b = jax.random.uniform(kb, (fan_out,), f32, -bound, bound)
    return w, b

  def bn(k, dim):
    kg, kb = jax.random.split(k)
    return dict(
        gamma=jax.random.uniform(kg, (dim,), f32, 0.5, 1.5),
        beta=jax.random.uniform(kb, (dim,), f32, -0.1, 0.1),
        mean=jnp.zeros((dim,), f32),    # fresh PyTorch running stats
        var=jnp.ones((dim,), f32),
    )

  wf1, bf1 = lin(keys[0], n_features, 128)
  wf2, bf2 = lin(keys[1], 128, embedding_dim)
  wp1, bp1 = lin(keys[2], embedding_dim * 3, 128)
  wp2, bp2 = lin(keys[3], 128, 64)
  wp3, bp3 = lin(keys[4], 64, 1)

  return dict(
      emb_business=jax.random.normal(keys[5], (n_businesses, embedding_dim), f32),
      emb_product=jax.random.normal(keys[6], (n_products, embedding_dim), f32),
      wf1=wf1, bf1=bf1, bn1=bn(keys[7], 128),
      wf2=wf2, bf2=bf2, bn2=bn(keys[8], embedding_dim),
      wp1=wp1, bp1=bp1, bn3=bn(keys[9], 128),
      wp2=wp2, bp2=bp2, wp3=wp3, bp3=bp3,
  )


def fold_params(p, eps=1e-5):
  """Prepare kernel params (eval mode).

  * BatchNorm1d folded into the preceding Linear (general fold:
    scale = gamma/sqrt(var+eps), shift = beta - mean*scale).
  * Embedding tables folded through the first 2E rows of predictor-L1's
    BN-folded weight, so the in-kernel one-hot gather directly produces the
    (TB, 128) L1 partial sums (fuses gather + concat, opts 1 & 9).
  * MXU operands cast to bf16 (f32 accumulation in-kernel); biases and the
    tiny final layer stay f32.
  """
  f32, bf16 = jnp.float32, jnp.bfloat16

  def fold(w, b, bn):
    scale = bn["gamma"] / jnp.sqrt(bn["var"] + eps)
    shift = bn["beta"] - bn["mean"] * scale
    return w * scale[None, :], (b * scale + shift)[None, :]

  wf1, bf1 = fold(p["wf1"], p["bf1"], p["bn1"])
  wf2, bf2 = fold(p["wf2"], p["bf2"], p["bn2"])
  wp1, bp1 = fold(p["wp1"], p["bp1"], p["bn3"])

  E = p["emb_business"].shape[1]
  wg_b = p["emb_business"] @ wp1[:E, :]        # (nB, 128): bemb's L1 contribution
  wg_p = p["emb_product"] @ wp1[E:2 * E, :]    # (nP, 128): pemb's L1 contribution
  wp1f = wp1[2 * E:, :]                        # (E, 128):  femb's L1 rows

  def pad8(x):                                 # zero rows never selected (ids < n)
    r = _round_up(x.shape[0], 8)
    return x if r == x.shape[0] else jnp.pad(x, ((0, r - x.shape[0]), (0, 0)))

  return dict(
      wg_b=pad8(wg_b).astype(bf16), wg_p=pad8(wg_p).astype(bf16),
      wf1=wf1.astype(bf16), bf1=bf1.astype(f32),
      wf2=wf2.astype(bf16), bf2=bf2.astype(f32),
      wp1f=wp1f.astype(bf16), bp1=bp1.astype(f32),
      wp2=p["wp2"].astype(bf16), bp2=p["bp2"][None, :].astype(f32),
      wp3=p["wp3"].reshape(1, -1).astype(f32),   # (1, 64) for the VPU epilogue
      bp3=p["bp3"].reshape(1, 1).astype(f32),
  )


# -----------------------------------------------------------------------------
# Pure-JAX f32 reference (raw, unfolded params) for correctness checking.
# -----------------------------------------------------------------------------
def reference_forward(business_ids, product_ids, features, p, eps=1e-5):
  def bn_eval(x, bn):
    return (x - bn["mean"]) / jnp.sqrt(bn["var"] + eps) * bn["gamma"] + bn["beta"]

  bemb = p["emb_business"][business_ids]
  pemb = p["emb_product"][product_ids]
  h = jax.nn.relu(bn_eval(features @ p["wf1"] + p["bf1"], p["bn1"]))
  femb = jax.nn.relu(bn_eval(h @ p["wf2"] + p["bf2"], p["bn2"]))
  comb = jnp.concatenate([bemb, pemb, femb], axis=1)
  z = jax.nn.relu(bn_eval(comb @ p["wp1"] + p["bp1"], p["bn3"]))
  z = jax.nn.relu(z @ p["wp2"] + p["bp2"])
  return jax.nn.sigmoid(z @ p["wp3"] + p["bp3"])[:, 0]


if __name__ == "__main__":
  n_businesses, n_products = 16, 16
  n_features, embedding_dim = 32, 64

  root = jax.random.PRNGKey(0)
  k_params = jax.random.fold_in(root, 1234)

  params = make_params(k_params, n_businesses, n_products, n_features,
                       embedding_dim)
  fparams = fold_params(params)

  # batch=10: single-tile + ragged-pad path; batch=200: even multi-tile path
  # (exercises the v7x 2-TensorCore grid split).
  for batch in (10, 200):
    kb, kp, kf = jax.random.split(jax.random.fold_in(root, batch), 3)
    business_ids = jax.random.randint(kb, (batch,), 0, n_businesses,
                                      dtype=jnp.int32)
    product_ids = jax.random.randint(kp, (batch,), 0, n_products,
                                     dtype=jnp.int32)
    features = jax.random.normal(kf, (batch, n_features), jnp.float32)

    scores = regularized_content_model_forward(business_ids, product_ids,
                                               features, fparams)
    scores = jax.block_until_ready(scores)

    assert scores.shape == (batch,)
    assert bool(jnp.all(jnp.isfinite(scores)))
    assert bool(jnp.all((scores >= 0.0) & (scores <= 1.0)))

    ref = reference_forward(business_ids, product_ids, features, params)
    # bf16 MXU path vs f32 reference -> relaxed tolerance (review note).
    np.testing.assert_allclose(np.asarray(scores), np.asarray(ref),
                               rtol=2e-2, atol=2e-2)

  print("KERNEL_OK")
</pallas_src>

<mosaic_0001>
module attributes {stable_mosaic.version = 11 : i64} {
  func.func @_content_model_kernel(%arg0: i32, %arg1: memref<16x2xi32, #tpu.memory_space<vmem>>, %arg2: memref<16x32xbf16, #tpu.memory_space<vmem>>, %arg3: memref<16x128xbf16, #tpu.memory_space<vmem>>, %arg4: memref<16x128xbf16, #tpu.memory_space<vmem>>, %arg5: memref<32x128xbf16, #tpu.memory_space<vmem>>, %arg6: memref<1x128xf32, #tpu.memory_space<vmem>>, %arg7: memref<128x64xbf16, #tpu.memory_space<vmem>>, %arg8: memref<1x64xf32, #tpu.memory_space<vmem>>, %arg9: memref<64x128xbf16, #tpu.memory_space<vmem>>, %arg10: memref<1x128xf32, #tpu.memory_space<vmem>>, %arg11: memref<128x64xbf16, #tpu.memory_space<vmem>>, %arg12: memref<1x64xf32, #tpu.memory_space<vmem>>, %arg13: memref<1x64xf32, #tpu.memory_space<vmem>>, %arg14: memref<1x1xf32, #tpu.memory_space<vmem>>, %arg15: memref<1x1x16xf32, #tpu.memory_space<vmem>>) attributes {dimension_semantics = [#tpu.dimension_semantics<parallel>], iteration_bounds = array<i64: 1>, scalar_prefetch = 0 : i64, scratch_operands = 0 : i64, tpu.core_type = #tpu.core_type<tc>, window_params = [{transform_indices = @transform_0, window_bounds = array<i64: 16, 2>}, {transform_indices = @transform_1, window_bounds = array<i64: 16, 32>}, {pipeline_mode = #tpu.pipeline_mode<synchronous>, transform_indices = @transform_2, window_bounds = array<i64: 16, 128>}, {pipeline_mode = #tpu.pipeline_mode<synchronous>, transform_indices = @transform_3, window_bounds = array<i64: 16, 128>}, {pipeline_mode = #tpu.pipeline_mode<synchronous>, transform_indices = @transform_4, window_bounds = array<i64: 32, 128>}, {pipeline_mode = #tpu.pipeline_mode<synchronous>, transform_indices = @transform_5, window_bounds = array<i64: 1, 128>}, {pipeline_mode = #tpu.pipeline_mode<synchronous>, transform_indices = @transform_6, window_bounds = array<i64: 128, 64>}, {pipeline_mode = #tpu.pipeline_mode<synchronous>, transform_indices = @transform_7, window_bounds = array<i64: 1, 64>}, {pipeline_mode = #tpu.pipeline_mode<synchronous>, transform_indices = @transform_8, window_bounds = array<i64: 64, 128>}, {pipeline_mode = #tpu.pipeline_mode<synchronous>, transform_indices = @transform_9, window_bounds = array<i64: 1, 128>}, {pipeline_mode = #tpu.pipeline_mode<synchronous>, transform_indices = @transform_10, window_bounds = array<i64: 128, 64>}, {pipeline_mode = #tpu.pipeline_mode<synchronous>, transform_indices = @transform_11, window_bounds = array<i64: 1, 64>}, {pipeline_mode = #tpu.pipeline_mode<synchronous>, transform_indices = @transform_12, window_bounds = array<i64: 1, 64>}, {pipeline_mode = #tpu.pipeline_mode<synchronous>, transform_indices = @transform_13, window_bounds = array<i64: 1, 1>}, {transform_indices = @transform_14, window_bounds = array<i64: 1, 1, 16>}]} {
    %c0 = arith.constant 0 : index
    %c0_0 = arith.constant 0 : index
    %0 = vector.load %arg1[%c0, %c0_0] : memref<16x2xi32, #tpu.memory_space<vmem>>, vector<16x1xi32>
    %c0_1 = arith.constant 0 : index
    %c1 = arith.constant 1 : index
    %1 = vector.load %arg1[%c0_1, %c1] : memref<16x2xi32, #tpu.memory_space<vmem>>, vector<16x1xi32>
    %2 = tpu.iota {dimensions = array<i32: 1>} : vector<16x16xi32>
    %3 = tpu.iota {dimensions = array<i32: 1>} : vector<16x16xi32>
    %4 = vector.broadcast %0 : vector<16x1xi32> to vector<16x16xi32>
    %5 = arith.cmpi eq, %4, %2 : vector<16x16xi32>
    %cst = arith.constant 1.000000e+00 : f32
    %cst_2 = arith.constant 0.000000e+00 : f32
    %6 = vector.broadcast %cst : f32 to vector<16x16xf32>
    %7 = vector.broadcast %cst_2 : f32 to vector<16x16xf32>
    %8 = arith.select %5, %6, %7 : vector<16x16xi1>, vector<16x16xf32>
    %9 = arith.truncf %8 : vector<16x16xf32> to vector<16x16xbf16>
    %10 = vector.broadcast %1 : vector<16x1xi32> to vector<16x16xi32>
    %11 = arith.cmpi eq, %10, %3 : vector<16x16xi32>
    %cst_3 = arith.constant 1.000000e+00 : f32
    %cst_4 = arith.constant 0.000000e+00 : f32
    %12 = vector.broadcast %cst_3 : f32 to vector<16x16xf32>
    %13 = vector.broadcast %cst_4 : f32 to vector<16x16xf32>
    %14 = arith.select %11, %12, %13 : vector<16x16xi1>, vector<16x16xf32>
    %15 = arith.truncf %14 : vector<16x16xf32> to vector<16x16xbf16>
    %c0_5 = arith.constant 0 : index
    %c0_6 = arith.constant 0 : index
    %16 = vector.load %arg3[%c0_5, %c0_6] : memref<16x128xbf16, #tpu.memory_space<vmem>>, vector<16x128xbf16>
    %cst_7 = arith.constant dense<0.000000e+00> : vector<16x128xf32>
    %17 = tpu.matmul %9, %16, %cst_7 {dimension_numbers = #tpu.dot_dimension_numbers<[1], [0], [0], [1], [0, 0, 1, 1], [], []>} : vector<16x16xbf16>, vector<16x128xbf16>, vector<16x128xf32> -> vector<16x128xf32>
    %c0_8 = arith.constant 0 : index
    %c0_9 = arith.constant 0 : index
    %18 = vector.load %arg4[%c0_8, %c0_9] : memref<16x128xbf16, #tpu.memory_space<vmem>>, vector<16x128xbf16>
    %cst_10 = arith.constant dense<0.000000e+00> : vector<16x128xf32>
    %19 = tpu.matmul %15, %18, %cst_10 {dimension_numbers = #tpu.dot_dimension_numbers<[1], [0], [0], [1], [0, 0, 1, 1], [], []>} : vector<16x16xbf16>, vector<16x128xbf16>, vector<16x128xf32> -> vector<16x128xf32>
    %20 = arith.addf %17, %19 : vector<16x128xf32>
    %c0_11 = arith.constant 0 : index
    %c0_12 = arith.constant 0 : index
    %21 = vector.load %arg2[%c0_11, %c0_12] : memref<16x32xbf16, #tpu.memory_space<vmem>>, vector<16x32xbf16>
    %c0_13 = arith.constant 0 : index
    %c0_14 = arith.constant 0 : index
    %22 = vector.load %arg5[%c0_13, %c0_14] : memref<32x128xbf16, #tpu.memory_space<vmem>>, vector<32x128xbf16>
    %cst_15 = arith.constant dense<0.000000e+00> : vector<16x128xf32>
    %23 = tpu.matmul %21, %22, %cst_15 {dimension_numbers = #tpu.dot_dimension_numbers<[1], [0], [0], [1], [0, 0, 1, 1], [], []>} : vector<16x32xbf16>, vector<32x128xbf16>, vector<16x128xf32> -> vector<16x128xf32>
    %c0_16 = arith.constant 0 : index
    %c0_17 = arith.constant 0 : index
    %24 = vector.load %arg6[%c0_16, %c0_17] : memref<1x128xf32, #tpu.memory_space<vmem>>, vector<1x128xf32>
    %25 = vector.broadcast %24 : vector<1x128xf32> to vector<16x128xf32>
    %26 = arith.addf %23, %25 : vector<16x128xf32>
    %cst_18 = arith.constant 0.000000e+00 : f32
    %27 = vector.broadcast %cst_18 : f32 to vector<16x128xf32>
    %28 = arith.maximumf %26, %27 : vector<16x128xf32>
    %29 = arith.truncf %28 : vector<16x128xf32> to vector<16x128xbf16>
    %c0_19 = arith.constant 0 : index
    %c0_20 = arith.constant 0 : index
    %30 = vector.load %arg7[%c0_19, %c0_20] : memref<128x64xbf16, #tpu.memory_space<vmem>>, vector<128x64xbf16>
    %cst_21 = arith.constant dense<0.000000e+00> : vector<16x64xf32>
    %31 = tpu.matmul %29, %30, %cst_21 {dimension_numbers = #tpu.dot_dimension_numbers<[1], [0], [0], [1], [0, 0, 1, 1], [], []>} : vector<16x128xbf16>, vector<128x64xbf16>, vector<16x64xf32> -> vector<16x64xf32>
    %c0_22 = arith.constant 0 : index
    %c0_23 = arith.constant 0 : index
    %32 = vector.load %arg8[%c0_22, %c0_23] : memref<1x64xf32, #tpu.memory_space<vmem>>, vector<1x64xf32>
    %33 = vector.broadcast %32 : vector<1x64xf32> to vector<16x64xf32>
    %34 = arith.addf %31, %33 : vector<16x64xf32>
    %cst_24 = arith.constant 0.000000e+00 : f32
    %35 = vector.broadcast %cst_24 : f32 to vector<16x64xf32>
    %36 = arith.maximumf %34, %35 : vector<16x64xf32>
    %37 = arith.truncf %36 : vector<16x64xf32> to vector<16x64xbf16>
    %c0_25 = arith.constant 0 : index
    %c0_26 = arith.constant 0 : index
    %38 = vector.load %arg9[%c0_25, %c0_26] : memref<64x128xbf16, #tpu.memory_space<vmem>>, vector<64x128xbf16>
    %cst_27 = arith.constant dense<0.000000e+00> : vector<16x128xf32>
    %39 = tpu.matmul %37, %38, %cst_27 {dimension_numbers = #tpu.dot_dimension_numbers<[1], [0], [0], [1], [0, 0, 1, 1], [], []>} : vector<16x64xbf16>, vector<64x128xbf16>, vector<16x128xf32> -> vector<16x128xf32>
    %40 = arith.addf %20, %39 : vector<16x128xf32>
    %c0_28 = arith.constant 0 : index
    %c0_29 = arith.constant 0 : index
    %41 = vector.load %arg10[%c0_28, %c0_29] : memref<1x128xf32, #tpu.memory_space<vmem>>, vector<1x128xf32>
    %42 = vector.broadcast %41 : vector<1x128xf32> to vector<16x128xf32>
    %43 = arith.addf %40, %42 : vector<16x128xf32>
    %cst_30 = arith.constant 0.000000e+00 : f32
    %44 = vector.broadcast %cst_30 : f32 to vector<16x128xf32>
    %45 = arith.maximumf %43, %44 : vector<16x128xf32>
    %46 = arith.truncf %45 : vector<16x128xf32> to vector<16x128xbf16>
    %c0_31 = arith.constant 0 : index
    %c0_32 = arith.constant 0 : index
    %47 = vector.load %arg11[%c0_31, %c0_32] : memref<128x64xbf16, #tpu.memory_space<vmem>>, vector<128x64xbf16>
    %cst_33 = arith.constant dense<0.000000e+00> : vector<16x64xf32>
    %48 = tpu.matmul %46, %47, %cst_33 {dimension_numbers = #tpu.dot_dimension_numbers<[1], [0], [0], [1], [0, 0, 1, 1], [], []>} : vector<16x128xbf16>, vector<128x64xbf16>, vector<16x64xf32> -> vector<16x64xf32>
    %c0_34 = arith.constant 0 : index
    %c0_35 = arith.constant 0 : index
    %49 = vector.load %arg12[%c0_34, %c0_35] : memref<1x64xf32, #tpu.memory_space<vmem>>, vector<1x64xf32>
    %50 = vector.broadcast %49 : vector<1x64xf32> to vector<16x64xf32>
    %51 = arith.addf %48, %50 : vector<16x64xf32>
    %cst_36 = arith.constant 0.000000e+00 : f32
    %52 = vector.broadcast %cst_36 : f32 to vector<16x64xf32>
    %53 = arith.maximumf %51, %52 : vector<16x64xf32>
    %c0_37 = arith.constant 0 : index
    %c0_38 = arith.constant 0 : index
    %54 = vector.load %arg13[%c0_37, %c0_38] : memref<1x64xf32, #tpu.memory_space<vmem>>, vector<1x64xf32>
    %55 = vector.broadcast %54 : vector<1x64xf32> to vector<16x64xf32>
    %56 = arith.mulf %53, %55 : vector<16x64xf32>
    %cst_39 = arith.constant dense<0.000000e+00> : vector<16xf32>
    %57 = vector.multi_reduction <add>, %56, %cst_39 [1] : vector<16x64xf32> to vector<16xf32>
    %58 = vector.shape_cast %57 : vector<16xf32> to vector<16x1xf32>
    %c0_40 = arith.constant 0 : index
    %c0_41 = arith.constant 0 : index
    %59 = vector.load %arg14[%c0_40, %c0_41] : memref<1x1xf32, #tpu.memory_space<vmem>>, vector<1x1xf32>
    %60 = vector.broadcast %59 : vector<1x1xf32> to vector<16x1xf32>
    %61 = arith.addf %58, %60 : vector<16x1xf32>
    %62 = tpu.transpose %61, [1, 0] : vector<16x1xf32> -> vector<1x16xf32>
    %63 = arith.negf %62 : vector<1x16xf32>
    %64 = math.exp %63 : vector<1x16xf32>
    %cst_42 = arith.constant 1.000000e+00 : f32
    %65 = vector.broadcast %cst_42 : f32 to vector<1x16xf32>
    %66 = arith.addf %65, %64 : vector<1x16xf32>
    %67 = arith.divf %65, %66 : vector<1x16xf32>
    %68 = vector.shape_cast %67 : vector<1x16xf32> to vector<1x1x16xf32>
    %c0_43 = arith.constant 0 : index
    %c0_44 = arith.constant 0 : index
    %c0_45 = arith.constant 0 : index
    %69 = vector.load %arg15[%c0_43, %c0_44, %c0_45] : memref<1x1x16xf32, #tpu.memory_space<vmem>>, vector<1x1x16xf32>
    tpu.vector_store %arg15[%c0_43, %c0_44, %c0_45], %68 {strides = array<i32>} : memref<1x1x16xf32, #tpu.memory_space<vmem>>, vector<1x1x16xf32>,
    return
  }
  func.func @transform_0(%arg0: i32) -> (i32, i32) {
    %c0_i32 = arith.constant 0 : i32
    %c0_i32_0 = arith.constant 0 : i32
    return %arg0, %c0_i32 : i32, i32
  }
  func.func @transform_1(%arg0: i32) -> (i32, i32) {
    %c0_i32 = arith.constant 0 : i32
    %c0_i32_0 = arith.constant 0 : i32
    return %arg0, %c0_i32 : i32, i32
  }
  func.func @transform_2(%arg0: i32) -> (i32, i32) {
    %c0_i32 = arith.constant 0 : i32
    %c0_i32_0 = arith.constant 0 : i32
    %c0_i32_1 = arith.constant 0 : i32
    return %c0_i32, %c0_i32_0 : i32, i32
  }
  func.func @transform_3(%arg0: i32) -> (i32, i32) {
    %c0_i32 = arith.constant 0 : i32
    %c0_i32_0 = arith.constant 0 : i32
    %c0_i32_1 = arith.constant 0 : i32
    return %c0_i32, %c0_i32_0 : i32, i32
  }
  func.func @transform_4(%arg0: i32) -> (i32, i32) {
    %c0_i32 = arith.constant 0 : i32
    %c0_i32_0 = arith.constant 0 : i32
    %c0_i32_1 = arith.constant 0 : i32
    return %c0_i32, %c0_i32_0 : i32, i32
  }
  func.func @transform_5(%arg0: i32) -> (i32, i32) {
    %c0_i32 = arith.constant 0 : i32
    %c0_i32_0 = arith.constant 0 : i32
    %c0_i32_1 = arith.constant 0 : i32
    return %c0_i32, %c0_i32_0 : i32, i32
  }
  func.func @transform_6(%arg0: i32) -> (i32, i32) {
    %c0_i32 = arith.constant 0 : i32
    %c0_i32_0 = arith.constant 0 : i32
    %c0_i32_1 = arith.constant 0 : i32
    return %c0_i32, %c0_i32_0 : i32, i32
  }
  func.func @transform_7(%arg0: i32) -> (i32, i32) {
    %c0_i32 = arith.constant 0 : i32
    %c0_i32_0 = arith.constant 0 : i32
    %c0_i32_1 = arith.constant 0 : i32
    return %c0_i32, %c0_i32_0 : i32, i32
  }
  func.func @transform_8(%arg0: i32) -> (i32, i32) {
    %c0_i32 = arith.constant 0 : i32
    %c0_i32_0 = arith.constant 0 : i32
    %c0_i32_1 = arith.constant 0 : i32
    return %c0_i32, %c0_i32_0 : i32, i32
  }
  func.func @transform_9(%arg0: i32) -> (i32, i32) {
    %c0_i32 = arith.constant 0 : i32
    %c0_i32_0 = arith.constant 0 : i32
    %c0_i32_1 = arith.constant 0 : i32
    return %c0_i32, %c0_i32_0 : i32, i32
  }
  func.func @transform_10(%arg0: i32) -> (i32, i32) {
    %c0_i32 = arith.constant 0 : i32
    %c0_i32_0 = arith.constant 0 : i32
    %c0_i32_1 = arith.constant 0 : i32
    return %c0_i32, %c0_i32_0 : i32, i32
  }
  func.func @transform_11(%arg0: i32) -> (i32, i32) {
    %c0_i32 = arith.constant 0 : i32
    %c0_i32_0 = arith.constant 0 : i32
    %c0_i32_1 = arith.constant 0 : i32
    return %c0_i32, %c0_i32_0 : i32, i32
  }
  func.func @transform_12(%arg0: i32) -> (i32, i32) {
    %c0_i32 = arith.constant 0 : i32
    %c0_i32_0 = arith.constant 0 : i32
    %c0_i32_1 = arith.constant 0 : i32
    return %c0_i32, %c0_i32_0 : i32, i32
  }
  func.func @transform_13(%arg0: i32) -> (i32, i32) {
    %c0_i32 = arith.constant 0 : i32
    %c0_i32_0 = arith.constant 0 : i32
    %c0_i32_1 = arith.constant 0 : i32
    return %c0_i32, %c0_i32_0 : i32, i32
  }
  func.func @transform_14(%arg0: i32) -> (i32, i32, i32) {
    %c0_i32 = arith.constant 0 : i32
    %c0_i32_0 = arith.constant 0 : i32
    %c0_i32_1 = arith.constant 0 : i32
    return %arg0, %c0_i32, %c0_i32_0 : i32, i32, i32
  }
}

</mosaic_0001>

<bundles_post_ra>
// kernel: regularized_content_model_forward.1
= control target key start
LH: loop header
LB: loop body
LE: loop exit
PB: predicated region body
PF: predicated region fallthrough
CT: control target
= control target key end

     0   :  { %v821_v0 = vmov 1   ;;  %v822_v1 = vmov 0   ;;  %v823_v4 = vmov 0.0   ;;  %vm824_vm0 = vmmov 0   ;;  %s1053_s0 = inlined_call_operand.vmem [shape: s32[16,2], index: 0, kind: input, shape index: {}]   ;;  %s1054_s2 = inlined_call_operand.vmem [shape: bf16[16,128], index: 2, kind: input, shape index: {}]   ;;  %s1055_s3 = inlined_call_operand.vmem [shape: bf16[16,128], index: 3, kind: input, shape index: {}]   ;;  %s1056_s4 = inlined_call_operand.vmem [shape: bf16[32,128], index: 4, kind: input, shape index: {}]   ;;  %s1057_s1 = inlined_call_operand.vmem [shape: bf16[16,32], index: 1, kind: input, shape index: {}]   ;;  %s1058_s6 = inlined_call_operand.vmem [shape: bf16[128,64], index: 6, kind: input, shape index: {}]   ;;  %s1059_s8 = inlined_call_operand.vmem [shape: bf16[64,128], index: 8, kind: input, shape index: {}]   ;;  %s1060_s5 = inlined_call_operand.vmem [shape: f32[1,128], index: 5, kind: input, shape index: {}]   ;;  %s1061_s10 = inlined_call_operand.vmem [shape: bf16[128,64], index: 10, kind: input, shape index: {}]   ;;  %s1062_s7 = inlined_call_operand.vmem [shape: f32[1,64], index: 7, kind: input, shape index: {}]   ;;  %s1063_s9 = inlined_call_operand.vmem [shape: f32[1,128], index: 9, kind: input, shape index: {}]   ;;  %s1064_s13 = inlined_call_operand.<no memory space> [shape: f32[1,1], index: 13, kind: input, shape index: {}]   ;;  %s1065_s11 = inlined_call_operand.vmem [shape: f32[1,64], index: 11, kind: input, shape index: {}]   ;;  %s1066_s12 = inlined_call_operand.vmem [shape: f32[1,64], index: 12, kind: input, shape index: {}]   ;;  %s1067_s14 = inlined_call_operand.vmem [shape: f32[1,1,16], index: 14, kind: output, shape index: {}]  }
   0x1   :  { %790 = vset.pattern.permute.xlu1 %v821_v0  ;;  %789 = vset.pattern.permute.xlu0 %v822_v1  ;;  %v50_v2 = vld [vmem:[%s1053_s0] sm:$0xff]  ;;  %v51_v3 = vld [vmem:[%s1053_s0 + $0x8] sm:$0xff]  ;;  %v52_v7 = vlaneseq  ;;  %vm86_vm5 = vcmask 130048   ;;  %vm211_vm6 = vcmask 261120   ;;  %v799_v24 = vld [vmem:[%s1058_s6 + $0x10] sm:$0xff]   ;;  %vm406_vm7 = vcmask 523264  }
   0x2   :  { %66 = vperm.xlu1 %790, %v50_v2   ;;  %55 = vperm.xlu0 %789, %v50_v2   ;;  %v792_v5 = vld [vmem:[%s1054_s2] sm:$0xff]   ;;  %v795_v20 = vld [vmem:[%s1056_s4 + $0x8] sm:$0xff]   ;;  %v800_v25 = vld [vmem:[%s1058_s6 + $0x18] sm:$0xff]   ;;  %vm641_vm8 = vcmask 122880  }
   0x3   :  { %719 = vmatprep.subr.bf16.mxu1 %v823_v4  ;;  %713 = vmatprep.subr.bf16.mxu0 %v823_v4  ;;  %v793_v6 = vld [vmem:[%s1055_s3] sm:$0xff]   ;;  %v53_v8 = vand.u32 127, %v52_v7  ;;  %v798_v23 = vld [vmem:[%s1058_s6 + $0x8] sm:$0xff]   ;;  %v803_v28 = vld [vmem:[%s1058_s6 + $0x30] sm:$0xff]  }
   0x4   :  { %720 = vmatpush3.bf16.msra.mxu1 %v792_v5  ;;  %714 = vmatpush3.bf16.msra.mxu0 %v793_v6  ;;  %v794_v17 = vld [vmem:[%s1056_s4] sm:$0xff]   ;;  %v802_v27 = vld [vmem:[%s1058_s6 + $0x28] sm:$0xff]   ;;  %v804_v29 = vld [vmem:[%s1058_s6 + $0x38] sm:$0xff]  }
   0x5   :  { %725 = vmatprep.subr.bf16.mxu1 %v823_v4  ;;  %715 = vmatprep.mubr.msk.bf16.mxu0 %vm824_vm0, %v823_v4  ;;  %v796_v21 = vld [vmem:[%s1057_s1] sm:$0xff]   ;;  %v806_v31 = vld [vmem:[%s1059_s8 + $0x8] sm:$0xff]   ;;  %v807_v52 = vld [vmem:[%s1059_s8 + $0x10] sm:$0xff]  }
   0x6   :  { %69 = vperm.xlu1 %790, %v51_v3   ;;  %58 = vperm.xlu0 %789, %v51_v3   ;;  %v797_v22 = vld [vmem:[%s1058_s6] sm:$0xff]   ;;  %v808_v53 = vld [vmem:[%s1059_s8 + $0x18] sm:$0xff]   ;;  %v810_v2 = vld [vmem:[%s1061_s10 + $0x8] sm:$0xff]  }
   0x7   :  { %721 = vmatprep.mubr.msk.bf16.mxu1 %vm824_vm0, %v823_v4  ;;  %753 = vmatprep.subr.bf16.mxu0 %v823_v4  ;;  %v801_v26 = vld [vmem:[%s1058_s6 + $0x20] sm:$0xff]   ;;  %v811_v3 = vld [vmem:[%s1061_s10 + $0x10] sm:$0xff]   ;;  %v812_v5 = vld [vmem:[%s1061_s10 + $0x18] sm:$0xff]  }
   0x8   :  { %v805_v30 = vld [vmem:[%s1059_s8] sm:$0xff]   ;;  %v814_v7 = vld [vmem:[%s1061_s10 + $0x28] sm:$0xff]  }
   0x9   :  { %v651_v42 = vld [vmem:[%s1060_s5] ss:$0 sm:$0xff] }
   0xa   :  { %v656_v54 = vld [vmem:[%s1062_s7] ss:$0 sm:$0xff] }
   0xb   :  { %v809_v63 = vld [vmem:[%s1061_s10] sm:$0xff]  }
   0xc   :  { %v813_v6 = vld [vmem:[%s1061_s10 + $0x20] sm:$0xff]  }
  0x81   :  { %v67_v9 = vpop.permute.xlu1 %66  ;;  %v56_v10 = vpop.permute.xlu0 %55 }
  0x82   :  { %vm71_vm1 = vcmp.eq.s32.totalorder %v67_v9, %v53_v8  ;;  %vm60_vm2 = vcmp.eq.s32.totalorder %v56_v10, %v53_v8  ;;  %v816_v9 = vld [vmem:[%s1061_s10 + $0x38] sm:$0xff]  }
  0x83   :  { %v73_v11 = vsel %vm71_vm1, 1.0, %v823_v4  ;;  %v62_v14 = vsel %vm60_vm2, 1.0, %v823_v4 }
  0x85   :  { %v70_v12 = vpop.permute.xlu1 %69  ;;  %v59_v13 = vpop.permute.xlu0 %58 }
  0x86   :  { %vm72_vm3 = vcmp.eq.s32.totalorder %v70_v12, %v53_v8  ;;  %vm61_vm4 = vcmp.eq.s32.totalorder %v59_v13, %v53_v8  ;;  %v815_v8 = vld [vmem:[%s1061_s10 + $0x30] sm:$0xff]  }
  0x87   :  { %v74_v15 = vsel %vm72_vm3, 1.0, %v823_v4  ;;  %v63_v16 = vsel %vm61_vm4, 1.0, %v823_v4 }
  0x88   :  { %v75_v18 = vpack.c.bf16 %v74_v15, %v73_v11  ;;  %v64_v19 = vpack.c.bf16 %v63_v16, %v62_v14  ;;  %v670_v11 = vld [vmem:[%s1063_s9] ss:$0 sm:$0xff] }
  0x8a   :  { %716 = vmatmul.mubr.msk.bf16.vlgmr.msra.gmra.mrb[0].mxu0 %vm86_vm5, %v75_v18  ;;  %722 = vmatmul.mubr.msk.bf16.vlgmr.msra.gmra.mrb[0].mxu1 %vm86_vm5, %v64_v19 }
  0x8b   :  { %726 = vmatpush3.bf16.msra.mxu1 %v794_v17  ;;  %729 = vmatprep.mubr.msk.bf16.mxu1 %vm824_vm0, %v823_v4 }
  0x8c   :  { %727 = vmatprep.subr.bf16.mxu1 %v823_v4  ;;  %761 = vmatprep.mubr.msk.bf16.mxu0 %vm824_vm0, %v823_v4 }
  0x8d   :  { %754 = vmatpush3.bf16.msra.mxu0 %v805_v30 }
  0x8e   :  { %755 = vmatprep.subr.bf16.mxu0 %v823_v4 }
  0x8f   :  { %728 = vmatpush3.bf16.msra.mxu1 %v795_v20 }
  0x90   :  { %733 = vmatprep.subr.bf16.mxu1 %v823_v4 }
  0x91   :  { %756 = vmatpush3.bf16.msra.mxu0 %v806_v31 }
  0x92   :  { %730 = vmatmul.mubr.msk.bf16.vlgmr.msra.gmra.mrb[4].mxu1 %vm211_vm6, %v796_v21  ;;  %757 = vmatprep.subr.bf16.mxu0 %v823_v4  ;;  %v19_v21 = vstv %s1064_s13 }
  0x93   :  { %734 = vmatpush3.bf16.msra.mxu1 %v797_v22  ;;  %749 = vmatprep.mubr.msk.bf16.mxu1 %vm824_vm0, %v823_v4  ;;  %20 = vst [vmem:[#allocation2] sm:$0x1] %v19_v21  ;;  %v671_v22 = vld [vmem:[%s1065_s11] ss:$0 sm:$0xff] }
  0x94   :  { %735 = vmatprep.subr.bf16.mxu1 %v823_v4 }
  0x95   :  { %758 = vmatpush3.bf16.msra.mxu0 %v807_v52 }
  0x96   :  { %759 = vmatprep.subr.bf16.mxu0 %v823_v4 }
  0x97   :  { %736 = vmatpush3.bf16.msra.mxu1 %v798_v23 }
  0x98   :  { %737 = vmatprep.subr.bf16.mxu1 %v823_v4 }
  0x99   :  { %760 = vmatpush3.bf16.msra.mxu0 %v808_v53 }
  0x9a   :  { %765 = vmatprep.subr.bf16.mxu0 %v823_v4 }
  0x9b   :  { %738 = vmatpush3.bf16.msra.mxu1 %v799_v24 }
  0x9c   :  { %739 = vmatprep.subr.bf16.mxu1 %v823_v4 }
  0x9f   :  { %740 = vmatpush3.bf16.msra.mxu1 %v800_v25 }
  0xa0   :  { %741 = vmatprep.subr.bf16.mxu1 %v823_v4 }
  0xa3   :  { %742 = vmatpush3.bf16.msra.mxu1 %v801_v26 }
  0xa4   :  { %743 = vmatprep.subr.bf16.mxu1 %v823_v4 }
  0xa7   :  { %744 = vmatpush3.bf16.msra.mxu1 %v802_v27  ;;  %v680_v27 = vld [vmem:[%s1066_s12] ss:$0 sm:$0xff] }
  0xa8   :  { %745 = vmatprep.subr.bf16.mxu1 %v823_v4 }
  0xab   :  { %746 = vmatpush3.bf16.msra.mxu1 %v803_v28 }
  0xac   :  { %747 = vmatprep.subr.bf16.mxu1 %v823_v4 }
  0xaf   :  { %748 = vmatpush3.bf16.msra.mxu1 %v804_v29 }
 0x15d   :  { %v124_v32 = vpop.f32.mrb[0].mxu0  ;;  %v174_v33 = vpop.f32.mrb[0].mxu1 }
 0x15e   :  { %v981_v34 = vadd.f32 %v174_v33, %v124_v32  ;;  %v717_v35 = vpop.f32.mrb[1].mxu0  ;;  %v723_v36 = vpop.f32.mrb[1].mxu1 }
 0x15f   :  { %v127_v37 = vpop.f32.mrb[2].mxu0  ;;  %v177_v38 = vpop.f32.mrb[2].mxu1  ;;  %v681_v36 = vld [vmem:[#allocation2] ss:$0 sm:$0xff] }
 0x160   :  { %v983_v39 = vadd.f32 %v177_v38, %v127_v37  ;;  %v724_v40 = vpop.f32.mrb[3].mxu1  ;;  %v718_v41 = vpop.f32.mrb[3].mxu0 }
 0x165   :  { %v249_v43 = vpop.f32.mrb[4].mxu1 }
 0x166   :  { %v250_v44 = vadd.f32 %v651_v42, %v249_v43  ;;  %v731_v45 = vpop.f32.mrb[5].mxu1 }
 0x167   :  { %v252_v46 = vpop.f32.mrb[6].mxu1 }
 0x168   :  { %v253_v47 = vadd.f32 %v651_v42, %v252_v46  ;;  %v732_v48 = vpop.f32.mrb[7].mxu1  ;;  %v256_v49 = vmax.f32 %v250_v44, 0.0 }
 0x16a   :  { %v257_v50 = vmax.f32 %v253_v47, 0.0 }
 0x16c   :  { %v258_v51 = vpack.c.bf16 %v257_v50, %v256_v49 }
 0x16e   :  { %750 = vmatmul.mubr.bf16.vlgmr.msra.gmra.mrb[8].mxu1 %v258_v51 }
 0x241   :  { %v364_v55 = vpop.f32.mrb[8].mxu1 }
 0x242   :  { %v365_v56 = vadd.f32 %v656_v54, %v364_v55  ;;  %v751_v57 = vpop.f32.mrb[9].mxu1 }
 0x243   :  { %v367_v58 = vpop.f32.mrb[10].mxu1 }
 0x244   :  { %v368_v59 = vadd.f32 %v656_v54, %v367_v58  ;;  %v752_v60 = vpop.f32.mrb[11].mxu1  ;;  %v371_v61 = vmax.f32 %v365_v56, 0.0 }
 0x246   :  { %v372_v62 = vmax.f32 %v368_v59, 0.0 }
 0x248   :  { %v373_v1 = vpack.c.bf16 %v372_v62, %v371_v61 }
 0x24a   :  { %762 = vmatmul.mubr.msk.bf16.vlgmr.msra.gmra.mrb[4].mxu0 %vm406_vm7, %v373_v1 }
 0x24b   :  { %766 = vmatpush3.bf16.msra.mxu0 %v809_v63  ;;  %781 = vmatprep.mubr.msk.bf16.mxu0 %vm824_vm0, %v823_v4 }
 0x24c   :  { %767 = vmatprep.subr.bf16.mxu0 %v823_v4 }
 0x24f   :  { %768 = vmatpush3.bf16.msra.mxu0 %v810_v2 }
 0x250   :  { %769 = vmatprep.subr.bf16.mxu0 %v823_v4 }
 0x253   :  { %770 = vmatpush3.bf16.msra.mxu0 %v811_v3 }
 0x254   :  { %771 = vmatprep.subr.bf16.mxu0 %v823_v4 }
 0x257   :  { %772 = vmatpush3.bf16.msra.mxu0 %v812_v5 }
 0x258   :  { %773 = vmatprep.subr.bf16.mxu0 %v823_v4 }
 0x25b   :  { %774 = vmatpush3.bf16.msra.mxu0 %v813_v6 }
 0x25c   :  { %775 = vmatprep.subr.bf16.mxu0 %v823_v4 }
 0x25f   :  { %776 = vmatpush3.bf16.msra.mxu0 %v814_v7 }
 0x260   :  { %777 = vmatprep.subr.bf16.mxu0 %v823_v4 }
 0x263   :  { %778 = vmatpush3.bf16.msra.mxu0 %v815_v8 }
 0x264   :  { %779 = vmatprep.subr.bf16.mxu0 %v823_v4 }
 0x267   :  { %780 = vmatpush3.bf16.msra.mxu0 %v816_v9 }
 0x31d   :  { %v444_v10 = vpop.f32.mrb[4].mxu0 }
 0x31e   :  { %v451_v12 = vadd.f32 %v444_v10, %v981_v34  ;;  %v763_v13 = vpop.f32.mrb[5].mxu0 }
 0x31f   :  { %v447_v14 = vpop.f32.mrb[6].mxu0 }
 0x320   :  { %v460_v15 = vadd.f32 %v670_v11, %v451_v12  ;;  %v452_v16 = vadd.f32 %v447_v14, %v983_v39  ;;  %v764_v17 = vpop.f32.mrb[7].mxu0 }
 0x322   :  { %v461_v18 = vadd.f32 %v670_v11, %v452_v16  ;;  %v462_v4 = vmax.f32 %v460_v15, 0.0 }
 0x324   :  { %v463_v19 = vmax.f32 %v461_v18, 0.0 }
 0x326   :  { %v464_v20 = vpack.c.bf16 %v463_v19, %v462_v4 }
 0x328   :  { %782 = vmatmul.mubr.bf16.vlgmr.msra.gmra.mrb[8].mxu0 %v464_v20 }
 0x3fb   :  { %v570_v23 = vpop.f32.mrb[8].mxu0 }
 0x3fc   :  { %v571_v24 = vadd.f32 %v671_v22, %v570_v23  ;;  %v783_v25 = vpop.f32.mrb[9].mxu0 }
 0x3fd   :  { %v573_v26 = vpop.f32.mrb[10].mxu0 }
 0x3fe   :  { %v577_v28 = vmax.f32 %v571_v24, 0.0  ;;  %v574_v29 = vadd.f32 %v671_v22, %v573_v26  ;;  %v784_v30 = vpop.f32.mrb[11].mxu0 }
 0x400   :  { %v578_v31 = vmax.f32 %v574_v29, 0.0  ;;  %v586_v32 = vmul.f32 %v680_v27, %v577_v28 }
 0x402   :  { %v588_v33 = vsel %vm406_vm7, %v586_v32, 0.0  ;;  %v587_v34 = vmul.f32 %v680_v27, %v578_v31 }
 0x403   :  { %589 = vadd.xlane.f32.xlu0 %v588_v33 }
 0x404   :  { %v591_v35 = vsel %vm406_vm7, %v587_v34, 0.0 }
 0x405   :  { %592 = vadd.xlane.f32.xlu1 %v591_v35 }
 0x490   :  { %v590_v37 = vpop.xlane.xlu0 %589 }
 0x491   :  { %v601_v38 = vadd.f32 %v681_v36, %v590_v37 }
 0x492   :  { %v593_v39 = vpop.xlane.xlu1 %592 }
 0x493   :  { %603 = vxpose.xlu0.b32.start [1/2] (short) (narrow) %v601_v38, 8  ;;  %v602_v40 = vadd.f32 %v681_v36, %v593_v39 }
 0x497   :  { %604 = vxpose.xlu0.b32.end [2/2] (short) (narrow) %v602_v40, 8 }
 0x4c0   :  { %791 = vset.pattern.permute.xlu0 %v821_v0 }
 0x513   :  { %v619_v41 = vpop.trf.xlu0 }
 0x514   :  { %v682_v42 = vmul.f32 -1.442695, %v619_v41 }
 0x516   :  { %817 = vpow2.f32 %v682_v42 }
 0x520   :  { %v818_v43 = vpop.eup %817 }
 0x521   :  { %v638_v44 = vadd.f32 1.0, %v818_v43 }
 0x523   :  { %819 = vrcp.f32 %v638_v44 }
 0x52d   :  { %v820_v45 = vpop.eup %819 }
 0x52e   :  { %642 = vst.msk [vmem:[%s1067_s14] sm:$0x1] %vm641_vm8, %v820_v45 }

</bundles_post_ra>
